<compile_context>
chip_gen: v7x
topology: tpu7x:2x2x1
jax: 0.10.0
libtpu: 0.0.40
codegen_flags: <defaults>
</compile_context>

<pallas_src>
import jax
import jax.numpy as jnp
from jax.experimental import pallas as pl
from jax.experimental.pallas import tpu as pltpu


def _affine_kernel(x_ref, scale_ref, shift_ref, o_ref):
    # All refs share the same (rows_per_tile, lane) shape: single fma per vreg,
    # no broadcasts, no layout plumbing.
    o_ref[...] = x_ref[...] * scale_ref[...] + shift_ref[...]


def _choose_row_tile(num_rows, max_rows):
    """Largest row-tile that divides num_rows and fits the VMEM budget,
    preferring a multiple of 8 (sublane-dense vregs)."""
    if num_rows <= max_rows:
        return num_rows
    best_any, best_mult8 = 1, 0
    for cand in range(1, max_rows + 1):
        if num_rows % cand == 0:
            best_any = cand
            if cand % 8 == 0:
                best_mult8 = cand
    return best_mult8 if best_mult8 else best_any


def layer_norm_affine(x, scale, shift, *, max_rows_per_tile=2048):
    """x * scale + shift; scale/shift have shape x.shape[1:] and broadcast
    over the batch axis, matching the PyTorch module."""
    N = x.shape[0]
    dim = tuple(x.shape[1:])
    assert scale.shape == dim and shift.shape == dim

    F = 1
    for d in dim:
        F *= d

    # Lane-dense 2-D view: (N, C, H, W) -> (N*R, L) with L a multiple of 128
    # whenever possible (C*H*W = 1024 = 8*128 for the toy shape -> one full
    # (8, 128) vreg per batch element).
    if F % 128 == 0:
        L = 128
        R = F // 128
    else:
        # Fallback: one full-feature row per batch element (block == full dim).
        L = F
        R = 1

    Rt = _choose_row_tile(R, max_rows_per_tile)  # <= ~1 MiB per f32 block
    num_tiles = R // Rt

    xf = x.reshape(N * R, L)
    sf = scale.reshape(R, L)
    tf = shift.reshape(R, L)

    # Grid: feature tiles outermost, batch innermost. scale/shift block index
    # depends only on the feature-tile axis -> reused across the batch loop.
    grid = (num_tiles, N)

    out_flat = pl.pallas_call(
        _affine_kernel,
        out_shape=jax.ShapeDtypeStruct((N * R, L), x.dtype),
        grid_spec=pltpu.PrefetchScalarGridSpec(
            num_scalar_prefetch=0,
            grid=grid,
            in_specs=[
                pl.BlockSpec((Rt, L), lambda j, i: (i * num_tiles + j, 0)),
                pl.BlockSpec((Rt, L), lambda j, i: (j, 0)),
                pl.BlockSpec((Rt, L), lambda j, i: (j, 0)),
            ],
            out_specs=pl.BlockSpec((Rt, L), lambda j, i: (i * num_tiles + j, 0)),
        ),
        compiler_params=pltpu.CompilerParams(
            dimension_semantics=("parallel", "parallel"),
            vmem_limit_bytes=32 * 1024 * 1024,
        ),
    )(xf, sf, tf)

    return out_flat.reshape(x.shape)


if __name__ == "__main__":
    key = jax.random.PRNGKey(0)
    k_x, k_scale, k_shift = jax.random.split(key, 3)

    # Module construction: LayerNorm(dim=(C, H, W)) with randn parameters.
    N, C, H, W = 2, 4, 16, 16
    dim = (C, H, W)
    scale = jax.random.normal(k_scale, dim, dtype=jnp.float32)
    shift = jax.random.normal(k_shift, dim, dtype=jnp.float32)

    x = jax.random.normal(k_x, (N, C, H, W), dtype=jnp.float32)

    out = layer_norm_affine(x, scale, shift)
    out = jax.block_until_ready(out)

    # Reference check against plain JAX broadcasting semantics.
    ref = x * scale + shift
    assert out.shape == ref.shape and out.dtype == ref.dtype
    assert jnp.allclose(out, ref, atol=1e-6, rtol=1e-6)

    print("KERNEL_OK")
</pallas_src>

<mosaic_0001>
module attributes {stable_mosaic.version = 11 : i64} {
  func.func @_affine_kernel(%arg0: i32, %arg1: i32, %arg2: memref<8x128xf32, #tpu.memory_space<vmem>>, %arg3: memref<8x128xf32, #tpu.memory_space<vmem>>, %arg4: memref<8x128xf32, #tpu.memory_space<vmem>>, %arg5: memref<8x128xf32, #tpu.memory_space<vmem>>) attributes {dimension_semantics = [#tpu.dimension_semantics<parallel>, #tpu.dimension_semantics<parallel>], iteration_bounds = array<i64: 1, 2>, scalar_prefetch = 0 : i64, scratch_operands = 0 : i64, tpu.core_type = #tpu.core_type<tc>, window_params = [{transform_indices = @transform_0, window_bounds = array<i64: 8, 128>}, {transform_indices = @transform_1, window_bounds = array<i64: 8, 128>}, {transform_indices = @transform_2, window_bounds = array<i64: 8, 128>}, {transform_indices = @transform_3, window_bounds = array<i64: 8, 128>}]} {
    %c0 = arith.constant 0 : index
    %c0_0 = arith.constant 0 : index
    %0 = vector.load %arg2[%c0, %c0_0] : memref<8x128xf32, #tpu.memory_space<vmem>>, vector<8x128xf32>
    %c0_1 = arith.constant 0 : index
    %c0_2 = arith.constant 0 : index
    %1 = vector.load %arg3[%c0_1, %c0_2] : memref<8x128xf32, #tpu.memory_space<vmem>>, vector<8x128xf32>
    %2 = arith.mulf %0, %1 : vector<8x128xf32>
    %c0_3 = arith.constant 0 : index
    %c0_4 = arith.constant 0 : index
    %3 = vector.load %arg4[%c0_3, %c0_4] : memref<8x128xf32, #tpu.memory_space<vmem>>, vector<8x128xf32>
    %4 = arith.addf %2, %3 : vector<8x128xf32>
    %c0_5 = arith.constant 0 : index
    %c0_6 = arith.constant 0 : index
    %5 = vector.load %arg5[%c0_5, %c0_6] : memref<8x128xf32, #tpu.memory_space<vmem>>, vector<8x128xf32>
    tpu.vector_store %arg5[%c0_5, %c0_6], %4 {strides = array<i32>} : memref<8x128xf32, #tpu.memory_space<vmem>>, vector<8x128xf32>,
    return
  }
  func.func @transform_0(%arg0: i32, %arg1: i32) -> (i32, i32) {
    %c1_i32 = arith.constant 1 : i32
    %0 = arith.muli %arg1, %c1_i32 : i32
    %1 = arith.addi %0, %arg0 : i32
    %c0_i32 = arith.constant 0 : i32
    %c0_i32_0 = arith.constant 0 : i32
    return %1, %c0_i32 : i32, i32
  }
  func.func @transform_1(%arg0: i32, %arg1: i32) -> (i32, i32) {
    %c0_i32 = arith.constant 0 : i32
    %c0_i32_0 = arith.constant 0 : i32
    return %arg0, %c0_i32 : i32, i32
  }
  func.func @transform_2(%arg0: i32, %arg1: i32) -> (i32, i32) {
    %c0_i32 = arith.constant 0 : i32
    %c0_i32_0 = arith.constant 0 : i32
    return %arg0, %c0_i32 : i32, i32
  }
  func.func @transform_3(%arg0: i32, %arg1: i32) -> (i32, i32) {
    %c1_i32 = arith.constant 1 : i32
    %0 = arith.muli %arg1, %c1_i32 : i32
    %1 = arith.addi %0, %arg0 : i32
    %c0_i32 = arith.constant 0 : i32
    %c0_i32_0 = arith.constant 0 : i32
    return %1, %c0_i32 : i32, i32
  }
}

</mosaic_0001>

<bundles_post_ra>
// kernel: tpu_custom_call.1
= control target key start
LH: loop header
LB: loop body
LE: loop exit
PB: predicated region body
PF: predicated region fallthrough
CT: control target
= control target key end

     0   :  { %8 = vsyncpa [#allocation3], 0  ;;  %s909_s0 = inlined_call_operand.hbm [shape: f32[16,128], index: 0, kind: input, shape index: {}]   ;;  %s910_s1 = inlined_call_operand.hbm [shape: f32[8,128], index: 1, kind: input, shape index: {}]   ;;  %s911_s2 = inlined_call_operand.hbm [shape: f32[8,128], index: 2, kind: input, shape index: {}]   ;;  %s912_s3 = inlined_call_operand.hbm [shape: f32[16,128], index: 3, kind: output, shape index: {}]  }
   0x1   :  { %10 = vsyncpa [#allocation3 + $0x1], 0 }
   0x2   :  { %11 = vsyncpa [#allocation6], 0 }
   0x3   :  { %12 = vsyncpa [#allocation4], 0 }
   0x4   :  { %14 = vsyncpa [#allocation4 + $0x1], 0  ;;  %s666_s12 = smov 0   ;;  %s668_s13 = smov 0  }
   0x5   :  { %s670_s14 = smov 0   ;;  %s672_s15 = smov 0  }
   0x6   :  { %s674_s16 = smov 0   ;;  %s676_s17 = smov 0  }
   0x7 LB: > { %s368_s18 = sadd.s32 4294967295, %s640_s17   ;;  %s369_s19 = sadd.s32 4294967294, %s640_s17   ;;  %s640_s17 = sphi %s676_s17, %s20_s17   ;;  %s636_s16 = sphi %s674_s16, %s935_s16   ;;  %s632_s15 = sphi %s672_s15, %s934_s15   ;;  %s628_s14 = sphi %s670_s14, %s933_s14   ;;  %s624_s13 = sphi %s668_s13, %s932_s13   ;;  %s620_s12 = sphi %s666_s12, %s931_s12  }
   0x8   : > { %p54_p0 = scmp.ne.s32.totalorder %s624_s13, %s620_s12  ;;  %p700_p1 = scmp.eq.s32.totalorder %s368_s18, 0 }
   0x9   : > { %p704_p2 = scmp.eq.s32.totalorder %s368_s18, 1  ;;  %p138_p3 = scmp.eq.s32.totalorder %s369_s19, 1 }
   0xa   : > { %s917_s20 = scalar_select %p700_p1, 1, 0 }
   0xb   : > { %s918_s21 = scalar_select %p704_p2, 1, 0 }
   0xc   : > { %p710_p4 = por %p700_p1, %p54_p0  ;;  %p370_p5 = scmp.ge.s32.totalorder %s640_s17, 1 }
   0xd   : > { %p715_p6 = por %p138_p3, %p54_p0  ;;  %p145_p7 = scmp.lt.s32.totalorder %s640_s17, 3 }
   0xe   : > { %s919_s22 = scalar_select %p710_p4, 1, 0 }
   0xf   : > { %s920_s23 = scalar_select %p715_p6, 1, 0 }
  0x10   : > { %p720_p8 = pnand %p370_p5, %p145_p7  ;;  %s642_s25 = smov [#allocation5]  }
  0x11   : > { %s160_s26 = sshll.u32 %s642_s25, 4  ;;  %s643_s27 = smov [#allocation7]   ;;  %s161_s26 = int_to_ptr.vmem [resolvable:$true] %s160_s26 }
  0x12   : > { %s921_s24 = scalar_select %p720_p8, 1, 0 }
  0x13   : > { %p397_p10 = pneg %p720_p8  ;;  %s173_s28 = sshll.u32 %s643_s27, 4  ;;  %s733_s28 = int_to_ptr.vmem [resolvable:$true] %s173_s28 }
  0x14   : > { %s468_s5 = scalar_lea.hbm %s910_s1, 128 }
  0x15   : > { %p729_p11 = pnand %p397_p10, %p700_p1  ;;  %p469_p12 = scmp.ne.s32.totalorder %s910_s1, %s468_s5 }
  0x16   : > { %p475_p5 = scmp.lt.u32.totalorder %s468_s5, %s910_s1 }
  0x17   : > { %p470_p13 = pneg %p729_p11 }
  0x19   : > { %p471_p0 = pnand %p470_p13, %p469_p12 }
  0x1b   : > { %p472_p3 = pneg %p471_p0 }
  0x1d   : > { %p477_p7 = pnand %p475_p5, %p472_p3 }
  0x1f   : > { %480 = shalt.err (!%p477_p7)
}
  0x20   : > { %s481_s10 = scalar_lea.vmem %s161_s26, 128  ;;  %p489_p1 = scmp.lt.s32.totalorder %s161_s26, %s161_s26 }
  0x21   : > { %p482_p10 = scmp.ne.s32.totalorder %s161_s26, %s481_s10  ;;  %p490_p4 = scmp.lt.s32.totalorder %s481_s10, %s481_s10 }
  0x23   : > { %p484_p9 = pnand %p482_p10, %p470_p13  ;;  %p491_p8 = por %p490_p4, %p489_p1 }
  0x25   : > { %p485_p6 = pneg %p484_p9 }
  0x27   : > { %p492_p2 = pnand %p491_p8, %p485_p6 }
  0x29   : > { %495 = shalt.err (!%p492_p2)
}
  0x2a   : > { %400 = dma.hbm_to_vmem [thread:$0]  (!%p729_p11), %s910_s1, 128, %s161_s26, [#allocation6]  }
  0x2b   : > { %s496_s27 = scalar_lea.hbm %s911_s2, 128 }
  0x2c   : > { %p497_p9 = scmp.ne.s32.totalorder %s911_s2, %s496_s27  ;;  %p503_p2 = scmp.lt.u32.totalorder %s496_s27, %s911_s2 }
  0x2e   : > { %p499_p1 = pnand %p497_p9, %p470_p13 }
  0x30   : > { %p500_p4 = pneg %p499_p1 }
  0x32   : > { %p505_p6 = pnand %p503_p2, %p500_p4 }
  0x34   : > { %508 = shalt.err (!%p505_p6)
}
  0x35   : > { %s509_s26 = scalar_lea.vmem %s733_s28, 128  ;;  %p517_p3 = scmp.lt.s32.totalorder %s733_s28, %s733_s28 }
  0x36   : > { %p510_p8 = scmp.ne.s32.totalorder %s733_s28, %s509_s26  ;;  %p518_p5 = scmp.lt.s32.totalorder %s509_s26, %s509_s26 }
  0x38   : > { %p512_p12 = pnand %p510_p8, %p470_p13  ;;  %p519_p7 = por %p518_p5, %p517_p3 }
  0x3a   : > { %p513_p0 = pneg %p512_p12 }
  0x3c   : > { %p520_p10 = pnand %p519_p7, %p513_p0 }
  0x3e   : > { %523 = shalt.err (!%p520_p10)
}
  0x3f   : > { %403 = dma.hbm_to_vmem [thread:$0]  (!%p729_p11), %s911_s2, 128, %s733_s28, [#allocation6]  }
  0x40   : > { %s29_s9 = sadd.s32 1, %s636_s16  ;;  %s41_s10 = sadd.s32 1, %s628_s14 }
  0x41   : > { %p30_p13 = scmp.ge.s32.totalorder %s29_s9, 2  ;;  %p48_p9 = scmp.ne.s32.totalorder %s628_s14, %s624_s13 }
  0x42   : > { %p49_p1 = scmp.eq.s32.totalorder %s640_s17, 0  ;;  %p414_p4 = scmp.lt.s32.totalorder %s640_s17, 2 }
  0x43   : > { %s937_s9 = smov (%p30_p13, %s29_s9), 0  ;;  %p923_p6 = scmp.ne.s32.totalorder %s918_s21, 0 }
  0x44   : > { %p50_p2 = por %p49_p1, %p48_p9  ;;  %s38_s11 = ssub.s32 %s636_s16, %s937_s9 }
  0x45   : > { %p792_p8 = por %p923_p6, %p48_p9  ;;  %s184_s18 = sand.u32 1, %s628_s14  }
  0x46   : > { %p39_p12 = scmp.eq.s32.totalorder %s38_s11, 0  ;;  %s374_s28 = sshll.u32 %s184_s18, 3 }
  0x47   : > { %s375_s19 = sshll.u32 %s636_s16, 7  ;;  %s188_s21 = scalar_lea.vmem [#allocation2], %s374_s28 }
  0x48   : > { %s801_s25 = scalar_select %p39_p12, %s628_s14, %s41_s10  }
  0x49   : > { %s806_s4 = scalar_lea.hbm %s909_s0, %s375_s19  ;;  %s196_s5 = sshll.u32 %s188_s21, 4  ;;  %s814_s5 = int_to_ptr.vmem [resolvable:$true] %s196_s5 }
  0x4a   : > { %p810_p11 = pnand %p414_p4, %p50_p2  ;;  %s185_s26 = scalar_lea.sflag [#allocation3], %s184_s18 }
  0x4b   : > { %s524_s7 = scalar_lea.hbm %s806_s4, 128  ;;  %s529_s11 = scalar_lea.hbm %s909_s0, 256 }
  0x4c   : > { %p525_p0 = scmp.ne.s32.totalorder %s806_s4, %s524_s7  ;;  %p526_p3 = pneg %p810_p11 }
  0x4d   : > { %p530_p10 = scmp.lt.u32.totalorder %s806_s4, %s909_s0  ;;  %p531_p13 = scmp.lt.u32.totalorder %s529_s11, %s524_s7 }
  0x4e   : > { %p527_p5 = pnand %p526_p3, %p525_p0  ;;  %p533_p1 = scmp.lt.u32.totalorder %s524_s7, %s806_s4 }
  0x4f   : > { %p532_p9 = por %p531_p13, %p530_p10 }
  0x50   : > { %p528_p7 = pneg %p527_p5 }
  0x51   : > { %p534_p4 = por %p533_p1, %p532_p9 }
  0x53   : > { %p535_p2 = pnand %p534_p4, %p528_p7 }
  0x55   : > { %538 = shalt.err (!%p535_p2)
}
  0x56   : > { %s539_s18 = scalar_lea.vmem %s814_s5, 128  ;;  %s644_s27 = smov [#allocation2]  }
  0x57   : > { %p540_p6 = scmp.ne.s32.totalorder %s814_s5, %s539_s18  ;;  %s544_s30 = sshll.u32 %s644_s27, 4  ;;  %s545_s30 = int_to_ptr.vmem [resolvable:$false] %s544_s30 }
  0x58   : > { %s546_s21 = scalar_lea.vmem %s545_s30, 256  ;;  %p547_p5 = scmp.lt.s32.totalorder %s814_s5, %s545_s30 }
  0x59   : > { %p542_p12 = pnand %p540_p6, %p526_p3  ;;  %p548_p10 = scmp.lt.s32.totalorder %s546_s21, %s539_s18 }
  0x5b   : > { %p543_p0 = pneg %p542_p12  ;;  %p549_p13 = por %p548_p10, %p547_p5 }
  0x5d   : > { %p550_p9 = pnand %p549_p13, %p543_p0 }
  0x5f   : > { %553 = shalt.err (!%p550_p9)
}
  0x60   : > { %407 = dma.hbm_to_vmem [thread:$0]  (!%p810_p11), %s806_s4, 128, %s814_s5, %s185_s26  }
  0x61   : > { %p926_p7 = scmp.ne.s32.totalorder %s921_s24, 0 }
  0x62   : > { %s844_s7 = sand.u32 (!%p926_p7), 1, %s624_s13   ;;  %p927_p3 = scmp.ne.s32.totalorder (!%p926_p7), %s919_s22, 0 }
  0x63   : > { %205 = sbr.rel (%p926_p7) target bundleno = 135 (0x87), region = 32  ;;  %s377_s8 = sshll.u32 (!%p926_p7), %s844_s7, 3 }
  0x64   : > { %s208_s10 = scalar_lea.sflag (!%p926_p7), [#allocation3], %s844_s7  ;;  %s211_s11 = scalar_lea.vmem (!%p926_p7), [#allocation2], %s377_s8 }
  0x6a   : > { %607 = dma.done.wait (%p927_p3), %s208_s10, 128  }
  0x6b   : > { %609 = vsyncadd (%p927_p3), %s208_s10, 4294967168  ;;  %p928_p1 = scmp.ne.s32.totalorder %s917_s20, 0 }
  0x6d   : > { %611 = dma.done.wait (%p928_p1), [#allocation6], 256  }
  0x6e   : > { %613 = vsyncadd (%p928_p1), [#allocation6], 4294967040  ;;  %v244_v0 = vld [vmem:[%s211_s11] sm:$0xff]  ;;  %v245_v1 = vld [vmem:[#allocation5] sm:$0xff]  ;;  %s241_s24 = scalar_lea.vmem [#allocation8], %s377_s8  ;;  %s382_s5 = sshll.u32 %s632_s15, 7 }
  0x6f   : > { %v247_v2 = vld [vmem:[#allocation7] sm:$0xff]  ;;  %s265_s4 = sshll.u32 %s241_s24, 4  ;;  %v246_v3 = vmul.f32 %v245_v1, %v244_v0  ;;  %s862_s20 = scalar_lea.hbm %s912_s3, %s382_s5  ;;  %s857_s4 = int_to_ptr.vmem [resolvable:$true] %s265_s4 }
  0x70   : > { %s251_s26 = scalar_lea.sflag [#allocation4], %s844_s7  ;;  %s554_s28 = scalar_lea.vmem %s857_s4, 128 }
  0x71   : > { %v248_v4 = vadd.f32 %v247_v2, %v246_v3  ;;  %p555_p11 = scmp.ne.s32.totalorder %s857_s4, %s554_s28  ;;  %s645_s15 = smov [#allocation8]  }
  0x72   : > { %s558_s19 = sshll.u32 %s645_s15, 4  ;;  %s559_s19 = int_to_ptr.vmem [resolvable:$false] %s558_s19 }
  0x73   : > { %249 = vst [vmem:[%s241_s24] sm:$0xff] %v248_v4  ;;  %p556_p4 = pnand %p555_p11, %p792_p8  ;;  %s560_s18 = scalar_lea.vmem %s559_s19, 256 }
  0x74   : > { %p561_p6 = scmp.lt.s32.totalorder %s857_s4, %s559_s19  ;;  %p562_p12 = scmp.lt.s32.totalorder %s560_s18, %s554_s28 }
  0x75   : > { %p557_p2 = pneg %p556_p4 }
  0x76   : > { %p563_p0 = por %p562_p12, %p561_p6 }
  0x78   : > { %p564_p5 = pnand %p563_p0, %p557_p2 }
  0x7a   : > { %567 = shalt.err (!%p564_p5)
}
  0x7b   : > { %s568_s27 = scalar_lea.hbm %s862_s20, 128  ;;  %s572_s7 = scalar_lea.hbm %s912_s3, 256 }
  0x7c   : > { %p569_p10 = scmp.ne.s32.totalorder %s862_s20, %s568_s27  ;;  %p573_p7 = scmp.lt.u32.totalorder %s862_s20, %s912_s3 }
  0x7d   : > { %p574_p3 = scmp.lt.u32.totalorder %s572_s7, %s568_s27  ;;  %p576_p11 = scmp.lt.u32.totalorder %s568_s27, %s862_s20 }
  0x7e   : > { %p570_p13 = pnand %p569_p10, %p792_p8 }
  0x7f   : > { %p575_p1 = por %p574_p3, %p573_p7 }
  0x80   : > { %p571_p9 = pneg %p570_p13 }
  0x81   : > { %p577_p4 = por %p576_p11, %p575_p1 }
  0x83   : > { %p578_p2 = pnand %p577_p4, %p571_p9 }
  0x85   : > { %581 = shalt.err (!%p578_p2)
}
  0x86   : > { %395 = dma.vmem_to_hbm [thread:$0]  (%p792_p8), %s857_s4, 128, %s862_s20, %s251_s26  }
  0x87 PF: > { %s277_s11 = sand.u32 1, %s620_s12   ;;  %p929_p6 = scmp.ne.s32.totalorder %s920_s23, 0 }
  0x88   : > { %p930_p12 = scmp.ge.s32.totalorder %s640_s17, 2  ;;  %s278_s24 = scalar_lea.sflag [#allocation4], %s277_s11 }
  0x8a   : > { %p409_p0 = pnand %p930_p12, %p929_p6 }
  0x8c   : > { %615 = dma.done.wait (!%p409_p0), %s278_s24, 128  }
  0x8d   : > { %617 = vsyncadd (!%p409_p0), %s278_s24, 4294967168  ;;  %s20_s17 = sadd.s32 1, %s640_s17   ;;  %s931_s12 = smov %s624_s13 }
  0x8e   : > { %p17_p5 = scmp.ge.s32.totalorder %s20_s17, 4   ;;  %s932_s13 = smov %s628_s14 }
  0x8f   : > { %s933_s14 = smov %s801_s25  ;;  %s934_s15 = smov %s636_s16 }
  0x90   : > { %s935_s16 = smov %s937_s9  ;;  %19 = sbr.rel (!%p17_p5) target bundleno = 7 (0x7), region = 87 }
  0x97   :  { %283 = vsyncpa [#allocation3], 1 }
  0x98   :  { %285 = vsyncpa [#allocation3 + $0x1], 1 }
  0x99   :  { %286 = vsyncpa [#allocation6], 1 }
  0x9a   :  { %287 = vsyncpa [#allocation4], 1 }
  0x9b   :  { %289 = vsyncpa [#allocation4 + $0x1], 1 }

</bundles_post_ra>
